<compile_context>
chip_gen: v7x
topology: tpu7x:2x2x1
jax: 0.10.0
libtpu: 0.0.40
codegen_flags: <defaults>
</compile_context>

<pallas_src>
import jax
import jax.numpy as jnp
from jax.experimental import pallas as pl
from jax.experimental.pallas import tpu as pltpu


def _round_up(x, m):
    return ((x + m - 1) // m) * m


def _decoder_kernel(h_ref, w_ref, b_ref, o_ref):
    # h_ref: (TM, dp)   w_ref: (dp, op)   b_ref: (1, op)   o_ref: (TM, op)
    acc = jnp.dot(h_ref[...], w_ref[...], preferred_element_type=jnp.float32)
    o_ref[...] = (acc + b_ref[...]).astype(o_ref.dtype)


def pack_decoder_params(W, b, *, dtype=None):
    """Pack nn.Linear(d, out_dim) params into the lane-dense layout.

    Hoisted out of the per-call path: call once per parameter set and reuse.
    Returns Wp: (d*P, out_dim*P) block-diagonal, bp: (1, out_dim*P), with
    P = 128 // d when d divides 128.

    NOTE: when 128 % d != 0 we fall back to P=1, which is correct but very
    lane-sparse on both the load and store paths - revisit if d changes.
    """
    out_dim, d = W.shape
    dtype = dtype or W.dtype
    P = (128 // d) if (d < 128 and 128 % d == 0) else 1
    Wt = W.T.astype(dtype)                         # (d, out_dim)
    if P > 1:
        eye = jnp.eye(P, dtype=Wt.dtype)
        Wp = jnp.einsum("pq,ij->piqj", eye, Wt).reshape(d * P, out_dim * P)
    else:
        Wp = Wt
    bp = jnp.tile(b.astype(dtype).reshape(1, out_dim), (1, P))  # (1, out_dim*P)
    return Wp, bp


def decoder_forward_packed(H, Wp, bp, *, block_rows=8192, target_steps=8):
    """H: (N, d), Wp/bp from pack_decoder_params  ->  (N, out_dim)."""
    N, d = H.shape
    dp, op = Wp.shape
    assert dp % d == 0, "packed weight / feature dim mismatch"
    P = dp // d
    out_dim = op // P
    block_rows = _round_up(block_rows, 16)

    # --- minimal padding: only up to a multiple of the packing factor P ---
    # (<= P-1 = 3 rows; zero rows when N % P == 0, so the reshape below is a
    # free row-major view and no extra HBM pass of H is made).
    n_pad = _round_up(N, P)
    pad_needed = n_pad != N
    Hp = jnp.pad(H, ((0, n_pad - N), (0, 0))) if pad_needed else H
    rows = n_pad // P
    Hp = Hp.reshape(rows, dp)  # row r holds original rows r*P .. r*P+P-1

    # --- tile size: aim for ~target_steps grid steps so v7x's two cores and
    # the double-buffered pipeline are actually used; clamp to [512, 8192]
    # packed rows (8192*128*4B = 4 MiB per tile; double-buffered it stays
    # inside v5e's 16 MiB scoped-VMEM default). Multiples of 16 sublanes so
    # bf16 streaming also tiles cleanly. ---
    tm = _round_up(max(1, -(-rows // target_steps)), 16)
    tm = max(tm, 512)
    tm = min(tm, block_rows)
    tm = min(tm, _round_up(rows, 16))      # never exceed the array extent
    num_blocks = pl.cdiv(rows, tm)         # ragged last block handled by Pallas

    if num_blocks >= 3:
        h_spec = pl.BlockSpec((tm, dp), lambda i: (i, 0),
                              pipeline_mode=pl.Buffered(3))
    else:
        h_spec = pl.BlockSpec((tm, dp), lambda i: (i, 0))

    itemsize = jnp.dtype(H.dtype).itemsize
    cost = pl.CostEstimate(
        flops=int(2 * num_blocks * tm * dp * op),       # actual kernel matmul
        transcendentals=0,
        bytes_accessed=int((rows * dp + dp * op + op + rows * op) * itemsize),
    )

    compiler_params = pltpu.CompilerParams(
        dimension_semantics=("parallel",),  # megacore sharding on v7x
        # If we had to pad, let XLA fuse the pad/reshape into the operand so H
        # is not materialized a second time in HBM.
        allow_input_fusion=[True, False, False] if pad_needed else None,
    )

    out_p = pl.pallas_call(
        _decoder_kernel,
        out_shape=jax.ShapeDtypeStruct((rows, op), H.dtype),
        grid_spec=pltpu.PrefetchScalarGridSpec(
            num_scalar_prefetch=0,
            grid=(num_blocks,),
            in_specs=[
                h_spec,                                    # streamed H tiles
                pl.BlockSpec((dp, op), lambda i: (0, 0)),  # resident weight
                pl.BlockSpec((1, op), lambda i: (0, 0)),   # resident bias
            ],
            out_specs=pl.BlockSpec((tm, op), lambda i: (i, 0)),
        ),
        compiler_params=compiler_params,
        cost_estimate=cost,
    )(Hp, Wp, bp)

    # Row-major byte-identical unpack, then drop the (<= P-1) padded rows.
    return out_p.reshape(n_pad, out_dim)[:N]


def decoder_forward(H, W, b, **kwargs):
    """Convenience wrapper matching nn.Linear(d, 2): out = H @ W^T + b."""
    Wp, bp = pack_decoder_params(W, b, dtype=H.dtype)
    return decoder_forward_packed(H, Wp, bp, **kwargs)


if __name__ == "__main__":
    d = 32  # hidden size

    key = jax.random.PRNGKey(0)
    k_w, k_b, k1, k2, k3 = jax.random.split(key, 5)

    # Deterministic synthetic parameters (nn.Linear(d, 2): W (2, d), b (2,)).
    bound = 1.0 / (d ** 0.5)
    W = jax.random.uniform(k_w, (2, d), jnp.float32, -bound, bound)
    b = jax.random.uniform(k_b, (2,), jnp.float32, -bound, bound)

    # Pack the params once (hoisted out of the per-forward path) and jit the
    # forward so pad/reshape/kernel live under one XLA program.
    Wp, bp = pack_decoder_params(W, b)
    fwd = jax.jit(decoder_forward_packed)

    def check(N, k):
        H = jax.random.normal(k, (N, d), jnp.float32)
        out = jax.block_until_ready(fwd(H, Wp, bp))
        ref = H @ W.T + b
        assert out.shape == (N, 2)
        assert jnp.allclose(out, ref, atol=1e-5, rtol=1e-5), f"mismatch at N={N}"

    # Small demo consistent with the module: 8 graph nodes, hidden=32.
    check(8, k1)
    # N not a multiple of the pack factor: minimal-pad + input-fusion path.
    check(1001, k2)
    # Multi-step grid: ragged last block, Buffered(3), parallel axis.
    check(20000, k3)

    print("KERNEL_OK")
</pallas_src>

<mosaic_0001>
module attributes {stable_mosaic.version = 11 : i64} {
  func.func @_decoder_kernel(%arg0: i32, %arg1: memref<16x128xf32, #tpu.memory_space<vmem>>, %arg2: memref<128x8xf32, #tpu.memory_space<vmem>>, %arg3: memref<1x8xf32, #tpu.memory_space<vmem>>, %arg4: memref<16x8xf32, #tpu.memory_space<vmem>>) attributes {dimension_semantics = [#tpu.dimension_semantics<parallel>], iteration_bounds = array<i64: 1>, scalar_prefetch = 0 : i64, scratch_operands = 0 : i64, tpu.core_type = #tpu.core_type<tc>, window_params = [{transform_indices = @transform_0, window_bounds = array<i64: 16, 128>}, {pipeline_mode = #tpu.pipeline_mode<synchronous>, transform_indices = @transform_1, window_bounds = array<i64: 128, 8>}, {pipeline_mode = #tpu.pipeline_mode<synchronous>, transform_indices = @transform_2, window_bounds = array<i64: 1, 8>}, {transform_indices = @transform_3, window_bounds = array<i64: 16, 8>}]} {
    %c0 = arith.constant 0 : index
    %c0_0 = arith.constant 0 : index
    %0 = vector.load %arg1[%c0, %c0_0] : memref<16x128xf32, #tpu.memory_space<vmem>>, vector<16x128xf32>
    %c0_1 = arith.constant 0 : index
    %c0_2 = arith.constant 0 : index
    %1 = vector.load %arg2[%c0_1, %c0_2] : memref<128x8xf32, #tpu.memory_space<vmem>>, vector<128x8xf32>
    %cst = arith.constant dense<0.000000e+00> : vector<16x8xf32>
    %2 = tpu.matmul %0, %1, %cst {dimension_numbers = #tpu.dot_dimension_numbers<[1], [0], [0], [1], [0, 0, 1, 1], [], []>} : vector<16x128xf32>, vector<128x8xf32>, vector<16x8xf32> -> vector<16x8xf32>
    %c0_3 = arith.constant 0 : index
    %c0_4 = arith.constant 0 : index
    %3 = vector.load %arg3[%c0_3, %c0_4] : memref<1x8xf32, #tpu.memory_space<vmem>>, vector<1x8xf32>
    %4 = vector.broadcast %3 : vector<1x8xf32> to vector<16x8xf32>
    %5 = arith.addf %2, %4 : vector<16x8xf32>
    %c0_5 = arith.constant 0 : index
    %c0_6 = arith.constant 0 : index
    %6 = vector.load %arg4[%c0_5, %c0_6] : memref<16x8xf32, #tpu.memory_space<vmem>>, vector<16x8xf32>
    tpu.vector_store %arg4[%c0_5, %c0_6], %5 {strides = array<i32>} : memref<16x8xf32, #tpu.memory_space<vmem>>, vector<16x8xf32>,
    return
  }
  func.func @transform_0(%arg0: i32) -> (i32, i32) {
    %c0_i32 = arith.constant 0 : i32
    %c0_i32_0 = arith.constant 0 : i32
    return %arg0, %c0_i32 : i32, i32
  }
  func.func @transform_1(%arg0: i32) -> (i32, i32) {
    %c0_i32 = arith.constant 0 : i32
    %c0_i32_0 = arith.constant 0 : i32
    %c0_i32_1 = arith.constant 0 : i32
    return %c0_i32, %c0_i32_0 : i32, i32
  }
  func.func @transform_2(%arg0: i32) -> (i32, i32) {
    %c0_i32 = arith.constant 0 : i32
    %c0_i32_0 = arith.constant 0 : i32
    %c0_i32_1 = arith.constant 0 : i32
    return %c0_i32, %c0_i32_0 : i32, i32
  }
  func.func @transform_3(%arg0: i32) -> (i32, i32) {
    %c0_i32 = arith.constant 0 : i32
    %c0_i32_0 = arith.constant 0 : i32
    return %arg0, %c0_i32 : i32, i32
  }
}

</mosaic_0001>

<bundles_post_ra>
// kernel: decoder_forward_packed.1
= control target key start
LH: loop header
LB: loop body
LE: loop exit
PB: predicated region body
PF: predicated region fallthrough
CT: control target
= control target key end

     0   :  { %vm114_vm0 = vcmask 64512   ;;  %s322_s0 = inlined_call_operand.vmem [shape: f32[2,128], index: 0, kind: input, shape index: {}]   ;;  %s323_s1 = inlined_call_operand.vmem [shape: f32[128,8], index: 1, kind: input, shape index: {}]   ;;  %s324_s2 = inlined_call_operand.vmem [shape: f32[1,8], index: 2, kind: input, shape index: {}]   ;;  %s325_s3 = inlined_call_operand.vmem [shape: f32[2,8], index: 3, kind: output, shape index: {}]  }
   0x1   :  { %v16_v0 = vld [vmem:[%s323_s1] sm:$0xff]  ;;  %v17_v1 = vld [vmem:[%s323_s1 + $0x8] sm:$0xff]  ;;  %v18_v2 = vld [vmem:[%s323_s1 + $0x10] sm:$0xff] }
   0x2   :  { %v210_v3 = vpack.c.bf16 %v17_v1, %v16_v0  ;;  %v19_v4 = vld [vmem:[%s323_s1 + $0x18] sm:$0xff]  ;;  %v20_v6 = vld [vmem:[%s323_s1 + $0x20] sm:$0xff]  ;;  %v21_v7 = vld [vmem:[%s323_s1 + $0x28] sm:$0xff] }
   0x3   :  { %v214_v5 = vpack.c.bf16 %v19_v4, %v18_v2  ;;  %v218_v8 = vpack.c.bf16 %v21_v7, %v20_v6  ;;  %v14_v9 = vld [vmem:[%s322_s0] sm:$0xff]  ;;  %v22_v10 = vld [vmem:[%s323_s1 + $0x30] sm:$0xff]  ;;  %v23_v11 = vld [vmem:[%s323_s1 + $0x38] sm:$0xff] }
   0x4   :  { %211 = vmatprep.subr.bf16.mxu0 %v210_v3  ;;  %207 = vmatprep.mubr.f32.mxu0 %v14_v9  ;;  %v222_v12 = vpack.c.bf16 %v23_v11, %v22_v10  ;;  %v24_v13 = vld [vmem:[%s323_s1 + $0x40] sm:$0xff]  ;;  %v25_v14 = vld [vmem:[%s323_s1 + $0x48] sm:$0xff]  ;;  %v26_v16 = vld [vmem:[%s323_s1 + $0x50] sm:$0xff] }
   0x5   :  { %213 = vmatpush3.bf16.msra.mxu0 %v210_v3  ;;  %v226_v15 = vpack.c.bf16 %v25_v14, %v24_v13  ;;  %v27_v17 = vld [vmem:[%s323_s1 + $0x58] sm:$0xff]  ;;  %v28_v19 = vld [vmem:[%s323_s1 + $0x60] sm:$0xff]  ;;  %v29_v20 = vld [vmem:[%s323_s1 + $0x68] sm:$0xff] }
   0x6   :  { %215 = vmatprep.subr.bf16.mxu0 %v214_v5  ;;  %v230_v18 = vpack.c.bf16 %v27_v17, %v26_v16  ;;  %v234_v21 = vpack.c.bf16 %v29_v20, %v28_v19  ;;  %v30_v22 = vld [vmem:[%s323_s1 + $0x70] sm:$0xff]  ;;  %v31_v23 = vld [vmem:[%s323_s1 + $0x78] sm:$0xff]  ;;  %v15_v25 = vld [vmem:[%s322_s0 + $0x8] sm:$0xff] }
   0x7   :  { %v238_v24 = vpack.c.bf16 %v31_v23, %v30_v22  ;;  %v156_v26 = vld [vmem:[%s324_s2] ss:$0 sm:$0xff] }
   0x9   :  { %217 = vmatpush3.bf16.msra.mxu0 %v214_v5 }
   0xa   :  { %219 = vmatprep.subr.bf16.mxu0 %v218_v8 }
   0xd   :  { %221 = vmatpush3.bf16.msra.mxu0 %v218_v8 }
   0xe   :  { %223 = vmatprep.subr.bf16.mxu0 %v222_v12 }
  0x11   :  { %225 = vmatpush3.bf16.msra.mxu0 %v222_v12 }
  0x12   :  { %227 = vmatprep.subr.bf16.mxu0 %v226_v15 }
  0x15   :  { %229 = vmatpush3.bf16.msra.mxu0 %v226_v15 }
  0x16   :  { %231 = vmatprep.subr.bf16.mxu0 %v230_v18 }
  0x19   :  { %233 = vmatpush3.bf16.msra.mxu0 %v230_v18 }
  0x1a   :  { %235 = vmatprep.subr.bf16.mxu0 %v234_v21 }
  0x1d   :  { %237 = vmatpush3.bf16.msra.mxu0 %v234_v21 }
  0x1e   :  { %239 = vmatprep.subr.bf16.mxu0 %v238_v24 }
  0x21   :  { %241 = vmatpush3.bf16.msra.mxu0 %v238_v24 }
  0x24   :  { %208 = vmatmul.mubr.f32.vlgmr.msra.gmra.mrb[0].mxu0 %v15_v25 }
  0xf7   :  { %v209_v27 = vpop.f32.mrb[0].mxu0 }
  0xf8   :  { %v105_v28 = vpop.f32.mrb[1].mxu0 }
  0xf9   :  { %v106_v29 = vadd.f32 %v156_v26, %v105_v28 }
  0xfb   :  { %115 = vst.msk [vmem:[#allocation2] sm:$0xff] %vm114_vm0, %v106_v29 }
 0x102   :  { %v134_v30 = vld [vmem:[#allocation2] sm:$0x3] }
 0x103   :  { %135 = vst [vmem:[%s325_s3] sm:$0x3] %v134_v30 }

</bundles_post_ra>
